<compile_context>
chip_gen: v7x
topology: tpu7x:2x2x1
jax: 0.10.0
libtpu: 0.0.40
codegen_flags: <defaults>
</compile_context>

<pallas_src>
import jax
import jax.numpy as jnp
from jax.experimental import pallas as pl
from jax.experimental.pallas import tpu as pltpu


def _round_up(x, m):
    return ((x + m - 1) // m) * m


def _vmem_capacity_bytes():
    """Physical per-core VMEM (v5e/v6e: 128 MiB, v7x: 64 MiB)."""
    try:
        cap = int(pltpu.get_tpu_info().vmem_capacity_bytes)
        if cap > 0:
            return cap
    except Exception:
        pass
    return 64 * 1024 * 1024  # conservative fallback (v7x per-TC size)


def _vmem_estimate(tm, H, tc, n_chunks, act_b, out_b, w_b):
    n_wbuf = 1 if n_chunks == 1 else 2          # grid-constant weights: 1 buffer
    acc = 0 if n_chunks == 1 else tm * H * 4    # f32 accumulator scratch
    return (2 * tm * H * act_b                  # x tile, double-buffered
            + 2 * tm * H * out_b                # out tile, double-buffered
            + n_wbuf * 3 * H * tc * w_b         # gate + up + proj weight chunks
            + acc
            + 3 * tm * tc * 4)                  # hg / hu / y temporaries


def _pick_tc(inter, target):
    """Largest 128-aligned divisor of `inter` that is <= target (else inter)."""
    if target >= inter:
        return inter
    t = (min(target, inter) // 128) * 128
    while t >= 128:
        if inter % t == 0:
            return t
        t -= 128
    return inter


def _pick_tm(tm, M, H, tc, n_chunks, act_b, out_b, w_b, vmem_cap):
    if tm is None:
        budget = int(vmem_cap * 0.72)
        tm = 128
        for cand in (1024, 768, 512, 384, 256, 128):
            if _vmem_estimate(cand, H, tc, n_chunks, act_b, out_b, w_b) <= budget:
                tm = cand
                break
    tm = max(8, _round_up(int(tm), 8))
    tm = min(tm, _round_up(M, 8))
    # Keep >= 2 token tiles when M is large enough: v7x has 2 TensorCores and
    # a single oversized tile would serialize the kernel onto one core.
    if M >= 512:
        tm = min(tm, _round_up((M + 1) // 2, 8))
    return tm


def _gated_mlp_single_kernel(x_ref, wg_ref, wu_ref, wp_ref, o_ref):
    """Single intermediate chunk: weights fully resident, no accumulator."""
    x = x_ref[...]
    hg = jnp.dot(x, wg_ref[...], preferred_element_type=jnp.float32)
    hu = jnp.dot(x, wu_ref[...], preferred_element_type=jnp.float32)
    y = (hg * jax.nn.sigmoid(hg)) * hu
    o_ref[...] = jnp.dot(y.astype(wp_ref.dtype), wp_ref[...],
                         preferred_element_type=jnp.float32).astype(o_ref.dtype)


def _gated_mlp_acc_kernel(x_ref, wg_ref, wu_ref, wp_ref, o_ref, acc_ref):
    """Streams the intermediate dim in chunks; accumulates in f32 VMEM.

    x_ref   : (TM, H)   token tile (already in compute dtype)
    wg_ref  : (H, TC)   gate-half column chunk of W_fc^T
    wu_ref  : (H, TC)   up-half   column chunk of W_fc^T
    wp_ref  : (TC, H)   matching row chunk of W_proj^T
    o_ref   : (TM, H)   output tile (written only on the last chunk)
    acc_ref : (TM, H)   f32 accumulator scratch (lives across the chunk axis)
    """
    c = pl.program_id(1)

    @pl.when(c == 0)
    def _init():
        acc_ref[...] = jnp.zeros_like(acc_ref)

    x = x_ref[...]
    hg = jnp.dot(x, wg_ref[...], preferred_element_type=jnp.float32)
    hu = jnp.dot(x, wu_ref[...], preferred_element_type=jnp.float32)
    y = (hg * jax.nn.sigmoid(hg)) * hu
    acc_ref[...] += jnp.dot(y.astype(wp_ref.dtype), wp_ref[...],
                            preferred_element_type=jnp.float32)

    @pl.when(c == pl.num_programs(1) - 1)
    def _fin():
        o_ref[...] = acc_ref[...].astype(o_ref.dtype)


def brick_forward(x, w_fc_t, w_proj_t, *, tm=None, tc=512):
    """Brick.forward == GatedMLP(x).

    x        : (B, S, H)
    w_fc_t   : (H, 2*I)  W_fc^T, columns [gate | up] (chunk(2,-1) order)
    w_proj_t : (I, H)    W_proj^T
    tm       : token-tile rows.  Default (None) auto-sizes from the device's
               VMEM capacity: ~1024 on v5e/v6e (128 MiB), ~384-512 on v7x
               (64 MiB).  Larger tm = higher weight-reuse (arithmetic
               intensity ~ tm FLOPs / weight byte).
    tc       : intermediate-dim chunk width (prefer multiples of 256); snapped
               to a 128-aligned divisor of I so no weight padding is needed.

    For best throughput pass bf16 weights and activations; the kernel runs the
    MXU in the weights' native dtype with f32 accumulation.
    """
    B, S, H = x.shape
    M = B * S
    inter = w_proj_t.shape[0]
    assert w_fc_t.shape == (H, 2 * inter) and w_proj_t.shape == (inter, H)
    # TODO(synk): config.bias assumed False (no bias terms), matching the default recpre config.

    compute_dtype = w_fc_t.dtype
    out_dtype = x.dtype

    # Hoist the activation cast out of the kernel (cast once, not per chunk).
    x2d = x.reshape(M, H)
    if x2d.dtype != compute_dtype:
        x2d = x2d.astype(compute_dtype)
    if w_proj_t.dtype != compute_dtype:
        w_proj_t = w_proj_t.astype(compute_dtype)

    # ---- intermediate-dim chunking ----------------------------------------
    if inter % 128 == 0:
        # Keep W_fc^T unsplit; gate / up halves selected purely via index_map.
        tc = _pick_tc(inter, int(tc))
        split_halves = False
    else:
        # Toy / odd intermediate widths: one-time split so every block is a
        # full-extent (lane-legal) block.  Cheap at these sizes.
        tc = inter
        split_halves = True
    n_chunks = inter // tc

    # ---- token tiling --------------------------------------------------------
    act_b = jnp.dtype(compute_dtype).itemsize
    out_b = jnp.dtype(out_dtype).itemsize
    w_b = act_b
    vmem_cap = _vmem_capacity_bytes()
    tm = _pick_tm(tm, M, H, tc, n_chunks, act_b, out_b, w_b, vmem_cap)
    m_pad = _round_up(M, tm)
    if m_pad != M:
        # Only pad when strictly necessary (zero rows are exact no-ops here).
        x2d = jnp.pad(x2d, ((0, m_pad - M), (0, 0)))

    # ---- VMEM limit derived from the actual device (v7x: 64 MiB) -----------
    vmem_est = _vmem_estimate(tm, H, tc, n_chunks, act_b, out_b, w_b)
    vmem_limit = int(min(max(vmem_est * 5 // 4, 32 * 1024 * 1024),
                         vmem_cap - (2 << 20)))

    # ---- weight views / index maps ------------------------------------------
    if split_halves:
        w_gate_arr = w_fc_t[:, :inter]
        w_up_arr = w_fc_t[:, inter:]
        gate_map = lambda i, c: (0, c)
        up_map = lambda i, c: (0, c)
    else:
        w_gate_arr = w_fc_t          # same HBM array, two BlockSpec windows
        w_up_arr = w_fc_t
        gate_map = lambda i, c: (0, c)
        up_map = lambda i, c: (0, c + n_chunks)   # up half starts at block I/tc

    def _w_spec(block_shape, index_map):
        if n_chunks == 1:
            # Grid-constant weights: single-buffer to save VMEM.
            return pl.BlockSpec(block_shape, index_map,
                                pipeline_mode=pl.Buffered(1))
        return pl.BlockSpec(block_shape, index_map)

    if n_chunks == 1:
        kernel = _gated_mlp_single_kernel
        scratch = []
    else:
        kernel = _gated_mlp_acc_kernel
        scratch = [pltpu.VMEM((tm, H), jnp.float32)]

    out2d = pl.pallas_call(
        kernel,
        out_shape=jax.ShapeDtypeStruct((m_pad, H), out_dtype),
        grid_spec=pltpu.PrefetchScalarGridSpec(
            num_scalar_prefetch=0,
            grid=(m_pad // tm, n_chunks),
            in_specs=[
                pl.BlockSpec((tm, H), lambda i, c: (i, 0)),   # token tile
                _w_spec((H, tc), gate_map),                   # gate weight chunk
                _w_spec((H, tc), up_map),                     # up weight chunk
                _w_spec((tc, H), lambda i, c: (c, 0)),        # proj weight chunk
            ],
            out_specs=pl.BlockSpec((tm, H), lambda i, c: (i, 0)),
            scratch_shapes=scratch,
        ),
        compiler_params=pltpu.CompilerParams(
            dimension_semantics=("parallel", "arbitrary"),
            vmem_limit_bytes=vmem_limit,
        ),
    )(x2d, w_gate_arr, w_up_arr, w_proj_t)

    if m_pad != M:
        out2d = out2d[:M]
    return out2d.reshape(B, S, H)


def reference_forward(x, w_fc_t, w_proj_t):
    h = jnp.einsum("bsh,hk->bsk", x, w_fc_t)
    inter = w_proj_t.shape[0]
    g, u = h[..., :inter], h[..., inter:]
    y = (g * jax.nn.sigmoid(g)) * u
    return jnp.einsum("bsi,ih->bsh", y, w_proj_t)


if __name__ == "__main__":
    key = jax.random.PRNGKey(0)

    def make_inputs(k, B, S, H, INTER, dtype=jnp.float32):
        kx, kfc, kproj = jax.random.split(k, 3)
        x = jax.random.normal(kx, (B, S, H), dtype=jnp.float32)
        # PyTorch nn.Linear weights are (out, in); we pass W^T as (in, out).
        w_fc_t = jax.random.normal(kfc, (H, 2 * INTER), dtype=jnp.float32) * (1.0 / jnp.sqrt(H))
        w_proj_t = jax.random.normal(kproj, (INTER, H), dtype=jnp.float32) * (1.0 / jnp.sqrt(INTER))
        return x.astype(dtype), w_fc_t.astype(dtype), w_proj_t.astype(dtype)

    k1, k2, k3 = jax.random.split(key, 3)

    # 1) Tiny odd intermediate width: split-halves fallback, single chunk,
    #    grid-constant single-buffered weights, no accumulator scratch.
    x, w_fc_t, w_proj_t = make_inputs(k1, 2, 8, 32, 64)
    out = jax.block_until_ready(brick_forward(x, w_fc_t, w_proj_t))
    ref = reference_forward(x, w_fc_t, w_proj_t)
    assert out.shape == x.shape
    assert jnp.allclose(out, ref, atol=1e-4, rtol=1e-4), "mismatch (single chunk)"

    # 2) Token count not divisible by the tile + multi-chunk accumulation,
    #    gate/up halves addressed via index_map on the UNSPLIT W_fc^T.
    x, w_fc_t, w_proj_t = make_inputs(k2, 2, 13, 32, 256)
    out = jax.block_until_ready(brick_forward(x, w_fc_t, w_proj_t, tm=32, tc=128))
    ref = reference_forward(x, w_fc_t, w_proj_t)
    assert out.shape == x.shape
    assert jnp.allclose(out, ref, atol=1e-4, rtol=1e-4), "mismatch (multi chunk)"

    # 3) bf16 weights + activations (the production MXU path), multi-chunk,
    #    auto tile sizing derived from the device VMEM capacity.
    x, w_fc_t, w_proj_t = make_inputs(k3, 2, 40, 128, 384, dtype=jnp.bfloat16)
    out = jax.block_until_ready(brick_forward(x, w_fc_t, w_proj_t, tc=128))
    ref = reference_forward(x.astype(jnp.float32), w_fc_t.astype(jnp.float32),
                            w_proj_t.astype(jnp.float32))
    assert out.shape == x.shape
    assert jnp.allclose(out.astype(jnp.float32), ref, atol=1e-1, rtol=1e-1), "mismatch (bf16)"

    print("KERNEL_OK")
</pallas_src>

<mosaic_0001>
module attributes {stable_mosaic.version = 11 : i64} {
  func.func @_gated_mlp_single_kernel(%arg0: i32, %arg1: i32, %arg2: memref<16x32xf32, #tpu.memory_space<vmem>>, %arg3: memref<32x64xf32, #tpu.memory_space<vmem>>, %arg4: memref<32x64xf32, #tpu.memory_space<vmem>>, %arg5: memref<64x32xf32, #tpu.memory_space<vmem>>, %arg6: memref<16x32xf32, #tpu.memory_space<vmem>>) attributes {dimension_semantics = [#tpu.dimension_semantics<parallel>, #tpu.dimension_semantics<arbitrary>], iteration_bounds = array<i64: 1, 1>, scalar_prefetch = 0 : i64, scratch_operands = 0 : i64, tpu.core_type = #tpu.core_type<tc>, window_params = [{transform_indices = @transform_0, window_bounds = array<i64: 16, 32>}, {pipeline_mode = #tpu.pipeline_mode<synchronous>, transform_indices = @transform_1, window_bounds = array<i64: 32, 64>}, {pipeline_mode = #tpu.pipeline_mode<synchronous>, transform_indices = @transform_2, window_bounds = array<i64: 32, 64>}, {pipeline_mode = #tpu.pipeline_mode<synchronous>, transform_indices = @transform_3, window_bounds = array<i64: 64, 32>}, {transform_indices = @transform_4, window_bounds = array<i64: 16, 32>}]} {
    %c0 = arith.constant 0 : index
    %c0_0 = arith.constant 0 : index
    %0 = vector.load %arg2[%c0, %c0_0] : memref<16x32xf32, #tpu.memory_space<vmem>>, vector<16x32xf32>
    %c0_1 = arith.constant 0 : index
    %c0_2 = arith.constant 0 : index
    %1 = vector.load %arg3[%c0_1, %c0_2] : memref<32x64xf32, #tpu.memory_space<vmem>>, vector<32x64xf32>
    %cst = arith.constant dense<0.000000e+00> : vector<16x64xf32>
    %2 = tpu.matmul %0, %1, %cst {dimension_numbers = #tpu.dot_dimension_numbers<[1], [0], [0], [1], [0, 0, 1, 1], [], []>} : vector<16x32xf32>, vector<32x64xf32>, vector<16x64xf32> -> vector<16x64xf32>
    %c0_3 = arith.constant 0 : index
    %c0_4 = arith.constant 0 : index
    %3 = vector.load %arg4[%c0_3, %c0_4] : memref<32x64xf32, #tpu.memory_space<vmem>>, vector<32x64xf32>
    %cst_5 = arith.constant dense<0.000000e+00> : vector<16x64xf32>
    %4 = tpu.matmul %0, %3, %cst_5 {dimension_numbers = #tpu.dot_dimension_numbers<[1], [0], [0], [1], [0, 0, 1, 1], [], []>} : vector<16x32xf32>, vector<32x64xf32>, vector<16x64xf32> -> vector<16x64xf32>
    %5 = arith.negf %2 : vector<16x64xf32>
    %6 = math.exp %5 : vector<16x64xf32>
    %cst_6 = arith.constant 1.000000e+00 : f32
    %7 = vector.broadcast %cst_6 : f32 to vector<16x64xf32>
    %8 = arith.addf %7, %6 : vector<16x64xf32>
    %9 = arith.divf %7, %8 : vector<16x64xf32>
    %10 = arith.mulf %2, %9 : vector<16x64xf32>
    %11 = arith.mulf %10, %4 : vector<16x64xf32>
    %c0_7 = arith.constant 0 : index
    %c0_8 = arith.constant 0 : index
    %12 = vector.load %arg5[%c0_7, %c0_8] : memref<64x32xf32, #tpu.memory_space<vmem>>, vector<64x32xf32>
    %cst_9 = arith.constant dense<0.000000e+00> : vector<16x32xf32>
    %13 = tpu.matmul %11, %12, %cst_9 {dimension_numbers = #tpu.dot_dimension_numbers<[1], [0], [0], [1], [0, 0, 1, 1], [], []>} : vector<16x64xf32>, vector<64x32xf32>, vector<16x32xf32> -> vector<16x32xf32>
    %c0_10 = arith.constant 0 : index
    %c0_11 = arith.constant 0 : index
    %14 = vector.load %arg6[%c0_10, %c0_11] : memref<16x32xf32, #tpu.memory_space<vmem>>, vector<16x32xf32>
    tpu.vector_store %arg6[%c0_10, %c0_11], %13 {strides = array<i32>} : memref<16x32xf32, #tpu.memory_space<vmem>>, vector<16x32xf32>,
    return
  }
  func.func @transform_0(%arg0: i32, %arg1: i32) -> (i32, i32) {
    %c0_i32 = arith.constant 0 : i32
    %c0_i32_0 = arith.constant 0 : i32
    return %arg0, %c0_i32 : i32, i32
  }
  func.func @transform_1(%arg0: i32, %arg1: i32) -> (i32, i32) {
    %c0_i32 = arith.constant 0 : i32
    %c0_i32_0 = arith.constant 0 : i32
    return %c0_i32, %arg1 : i32, i32
  }
  func.func @transform_2(%arg0: i32, %arg1: i32) -> (i32, i32) {
    %c0_i32 = arith.constant 0 : i32
    %c0_i32_0 = arith.constant 0 : i32
    return %c0_i32, %arg1 : i32, i32
  }
  func.func @transform_3(%arg0: i32, %arg1: i32) -> (i32, i32) {
    %c0_i32 = arith.constant 0 : i32
    %c0_i32_0 = arith.constant 0 : i32
    return %arg1, %c0_i32 : i32, i32
  }
  func.func @transform_4(%arg0: i32, %arg1: i32) -> (i32, i32) {
    %c0_i32 = arith.constant 0 : i32
    %c0_i32_0 = arith.constant 0 : i32
    return %arg0, %c0_i32 : i32, i32
  }
}

</mosaic_0001>

<bundles_post_ra>
// kernel: tpu_custom_call.1
= control target key start
LH: loop header
LB: loop body
LE: loop exit
PB: predicated region body
PF: predicated region fallthrough
CT: control target
= control target key end

     0   :  { %vm24_vm0 = vcmask 261120   ;;  %s547_s0 = inlined_call_operand.vmem [shape: f32[16,32], index: 0, kind: input, shape index: {}]   ;;  %s548_s1 = inlined_call_operand.vmem [shape: f32[32,64], index: 1, kind: input, shape index: {}]   ;;  %s549_s2 = inlined_call_operand.vmem [shape: f32[32,64], index: 2, kind: input, shape index: {}]   ;;  %s550_s3 = inlined_call_operand.vmem [shape: f32[64,32], index: 3, kind: input, shape index: {}]   ;;  %s551_s4 = inlined_call_operand.hbm [shape: f32[16,32], index: 4, kind: output, shape index: {}]  }
   0x1   :  { %v20_v0 = vld [vmem:[%s548_s1] sm:$0xff]  ;;  %v21_v1 = vld [vmem:[%s548_s1 + $0x8] sm:$0xff]  ;;  %v22_v2 = vld [vmem:[%s548_s1 + $0x10] sm:$0xff] }
   0x2   :  { %v380_v3 = vpack.c.bf16 %v21_v1, %v20_v0  ;;  %v23_v4 = vld [vmem:[%s548_s1 + $0x18] sm:$0xff]  ;;  %v18_v5 = vld [vmem:[%s547_s0] sm:$0xff]  ;;  %v107_v8 = vld [vmem:[%s549_s2 + $0x8] sm:$0xff] }
   0x3   :  { %v384_v6 = vpack.c.bf16 %v23_v4, %v22_v2  ;;  %347 = vmatprep.mubr.msk.f32.mxu1 %vm24_vm0, %v18_v5  ;;  %v106_v7 = vld [vmem:[%s549_s2] sm:$0xff] }
   0x4   :  { %381 = vmatprep.subr.bf16.mxu1 %v380_v3 }
   0x5   :  { %9 = vsyncpa [#allocation3], 0  ;;  %383 = vmatpush3.bf16.msra.mxu1 %v380_v3  ;;  %v388_v9 = vpack.c.bf16 %v107_v8, %v106_v7  ;;  %v108_v10 = vld [vmem:[%s549_s2 + $0x10] sm:$0xff]  ;;  %v109_v11 = vld [vmem:[%s549_s2 + $0x18] sm:$0xff]  ;;  %vm209_vm1 = vcmask 523264  }
   0x6   :  { %385 = vmatprep.subr.bf16.mxu1 %v384_v6  ;;  %v19_v12 = vld [vmem:[%s547_s0 + $0x8] sm:$0xff]  ;;  %v392_v13 = vpack.c.bf16 %v109_v11, %v108_v10  ;;  %v201_v14 = vld [vmem:[%s550_s3] sm:$0xff]  ;;  %v203_v17 = vld [vmem:[%s550_s3 + $0x10] sm:$0xff] }
   0x7   :  { %v202_v15 = vld [vmem:[%s550_s3 + $0x8] sm:$0xff]  ;;  %v204_v18 = vld [vmem:[%s550_s3 + $0x18] sm:$0xff]  ;;  %v205_v20 = vld [vmem:[%s550_s3 + $0x20] sm:$0xff] }
   0x8   :  { %v396_v16 = vpack.c.bf16 %v202_v15, %v201_v14  ;;  %v400_v19 = vpack.c.bf16 %v204_v18, %v203_v17  ;;  %v206_v21 = vld [vmem:[%s550_s3 + $0x28] sm:$0xff]  ;;  %v207_v23 = vld [vmem:[%s550_s3 + $0x30] sm:$0xff]  ;;  %v208_v24 = vld [vmem:[%s550_s3 + $0x38] sm:$0xff]  ;;  %s447_s3 = smov [#allocation2]  }
   0x9   :  { %387 = vmatpush3.bf16.msra.mxu1 %v384_v6  ;;  %v404_v22 = vpack.c.bf16 %v206_v21, %v205_v20  ;;  %v408_v25 = vpack.c.bf16 %v208_v24, %v207_v23  ;;  %s298_s22 = sshll.u32 %s447_s3, 4  ;;  %s299_s22 = int_to_ptr.vmem [resolvable:$true] %s298_s22 }
   0xa   :  { %389 = vmatprep.subr.bf16.mxu1 %v388_v9  ;;  %397 = vmatprep.subr.bf16.mxu0 %v396_v16  ;;  %s423_s23 = scalar_lea.vmem %s299_s22, 256  ;;  %p428_p1 = scmp.lt.s32.totalorder %s299_s22, %s299_s22 }
   0xb   :  { %399 = vmatpush3.bf16.msra.mxu0 %v396_v16  ;;  %p424_p0 = scmp.ne.s32.totalorder %s299_s22, %s423_s23  ;;  %p429_p2 = scmp.lt.s32.totalorder %s423_s23, %s423_s23 }
   0xc   :  { %348 = vmatmul.mubr.msk.f32.vlgmr.msra.gmra.mrb[0].mxu1 %vm24_vm0, %v19_v12  ;;  %401 = vmatprep.subr.bf16.mxu0 %v400_v19 }
   0xd   :  { %391 = vmatpush3.bf16.msra.mxu1 %v388_v9  ;;  %358 = vmatprep.mubr.msk.f32.mxu1 %vm24_vm0, %v18_v5  ;;  %p430_p3 = por %p429_p2, %p428_p1 }
   0xe   :  { %393 = vmatprep.subr.bf16.mxu1 %v392_v13 }
   0xf   :  { %403 = vmatpush3.bf16.msra.mxu0 %v400_v19  ;;  %p431_p4 = pnand %p430_p3, %p424_p0 }
  0x10   :  { %405 = vmatprep.subr.bf16.mxu0 %v404_v22 }
  0x11   :  { %395 = vmatpush3.bf16.msra.mxu1 %v392_v13 }
  0x13   :  { %407 = vmatpush3.bf16.msra.mxu0 %v404_v22 }
  0x14   :  { %359 = vmatmul.mubr.msk.f32.vlgmr.msra.gmra.mrb[2].mxu1 %vm24_vm0, %v19_v12  ;;  %409 = vmatprep.subr.bf16.mxu0 %v408_v25 }
  0x17   :  { %411 = vmatpush3.bf16.msra.mxu0 %v408_v25 }
  0xdf   :  { %v349_v26 = vpop.f32.mrb[0].mxu1 }
  0xe0   :  { %v314_v27 = vmul.f32 -1.442695, %v349_v26  ;;  %v97_v28 = vpop.f32.mrb[1].mxu1 }
  0xe1   :  { %v313_v29 = vmul.f32 -1.442695, %v97_v28 }
  0xe2   :  { %415 = vpow2.f32 %v314_v27 }
  0xe3   :  { %417 = vpow2.f32 %v313_v29 }
  0xe7   :  { %v360_v30 = vpop.f32.mrb[2].mxu1 }
  0xe8   :  { %v176_v31 = vpop.f32.mrb[3].mxu1 }
  0xec   :  { %v416_v32 = vpop.eup %415 }
  0xed   :  { %v418_v33 = vpop.eup %417  ;;  %v192_v34 = vadd.f32 1.0, %v416_v32 }
  0xee   :  { %v191_v35 = vadd.f32 1.0, %v418_v33 }
  0xef   :  { %419 = vrcp.f32 %v192_v34 }
  0xf0   :  { %421 = vrcp.f32 %v191_v35 }
  0xf9   :  { %v420_v36 = vpop.eup %419 }
  0xfa   :  { %v422_v37 = vpop.eup %421  ;;  %v198_v38 = vmul.f32 %v420_v36, %v349_v26 }
  0xfb   :  { %v197_v39 = vmul.f32 %v422_v37, %v97_v28 }
  0xfc   :  { %v200_v40 = vmul.f32 %v360_v30, %v198_v38 }
  0xfd   :  { %v199_v41 = vmul.f32 %v197_v39, %v176_v31 }
  0xff   :  { %377 = vmatprep.mubr.msk.f32.mxu0 %vm209_vm1, %v199_v41 }
 0x100   :  { %378 = vmatmul.mubr.msk.f32.vlgmr.msra.gmra.mrb[0].mxu0 %vm209_vm1, %v200_v40 }
 0x1d3   :  { %v379_v42 = vpop.f32.mrb[0].mxu0 }
 0x1d4   :  { %292 = vst.msk [vmem:[#allocation2 + $0x8] sm:$0xff] %vm24_vm0, %v379_v42  ;;  %v282_v43 = vpop.f32.mrb[1].mxu0 }
 0x1d5   :  { %291 = vst.msk [vmem:[#allocation2] sm:$0xff] %vm24_vm0, %v282_v43 }
 0x1d6   :  { %434 = shalt.err (!%p431_p4)
}
 0x1d7   :  { %s435_s26 = scalar_lea.hbm %s551_s4, 256 }
 0x1d8   :  { %p436_p5 = scmp.ne.s32.totalorder %s551_s4, %s435_s26  ;;  %p439_p6 = scmp.lt.u32.totalorder %s435_s26, %s551_s4 }
 0x1da   :  { %p441_p7 = pnand %p439_p6, %p436_p5 }
 0x1dc   :  { %444 = shalt.err (!%p441_p7)
}
 0x1dd   :  { %s448_s30 = smov 128   ;;  %s449_s5 = smov 8  }
 0x1de   :  { %304 = dma.vmem_to_hbm [thread:$0]  %s299_s22, 256, %s551_s4, [#allocation3], %s448_s30, %s448_s30, %s449_s5  }
 0x1df   :  { %445 = dma.done.wait [#allocation3], 256  }
 0x1e0   :  { %446 = vsyncadd [#allocation3], 4294967040 }
 0x1e1   :  { %308 = vsyncpa [#allocation3], 1 }

</bundles_post_ra>
